<compile_context>
chip_gen: v6e
topology: v6e:2x2x1
jax: 0.10.0
libtpu: 0.0.40
codegen_flags: <defaults>
</compile_context>

<pallas_src>
from functools import partial

import jax
import jax.numpy as jnp
from jax.experimental import pallas as pl
from jax.experimental.pallas import tpu as pltpu


def _cdiv(a, b):
    return -(-a // b)


def _round_up(a, b):
    return _cdiv(a, b) * b


def _narx_kernel(max_delay, ngrid, num_layers, block_n, compute_dtype,
                 x_ref, halo_ref, w_eff_ref, b_in_ref, w_cell_ref,
                 b_cell_ref, w_out_ref, b_out_ref, o_ref):
    """Lane-dense NARX block.

    x_ref   : (nx, B)      columns [i*B, i*B + B) of the lane-transposed x.
    halo_ref: (nx, D_pad)  columns [i*B + B, i*B + B + D_pad)   (delay halo).
    w_eff   : (max_delay, hidden, nx)  linearIn weights folded per delay offset.
    o_ref   : (ny, B)      lane-dense output block (unmasked vst).
    """
    base = x_ref[...]                                   # (nx, B)  compute_dtype

    # linearIn, one MXU dot per distinct delay offset.  Offset 0 reads the base
    # block directly and initializes the accumulator.
    acc = jnp.dot(w_eff_ref[0], base, preferred_element_type=jnp.float32)
    if max_delay > 1:
        xw = jnp.concatenate([base, halo_ref[...]], axis=1)   # (nx, B + D_pad)
        for d in range(1, max_delay):
            c = d * ngrid
            acc = acc + jnp.dot(w_eff_ref[d], xw[:, c:c + block_n],
                                preferred_element_type=jnp.float32)
    h = jnp.maximum(acc + b_in_ref[...], 0.0)           # (hidden, B)  f32

    # num_layers applications of the (shared) RNNCell with zero hidden state.
    w_cell = w_cell_ref[...]
    b_cell = b_cell_ref[...]
    for _ in range(num_layers):
        pre = jnp.dot(w_cell, h.astype(compute_dtype),
                      preferred_element_type=jnp.float32) + b_cell
        h = jnp.tanh(pre.astype(compute_dtype))         # bf16 tanh on bf16 path

    # linearOut -> lane-dense (ny, B) store.
    o_ref[...] = (jnp.dot(w_out_ref[...], h.astype(compute_dtype),
                          preferred_element_type=jnp.float32)
                  + b_out_ref[...]).astype(o_ref.dtype)


@partial(jax.jit, static_argnames=("nx", "ny", "input_delay", "feedback_delay",
                                   "num_layers", "block_n", "compute_dtype"))
def narx_forward(x, params, *, nx, ny, input_delay, feedback_delay, num_layers,
                 block_n=1024, compute_dtype=jnp.float32):
    """x: (nt, ngrid, nx) float32.  Returns (nt, ngrid, ny) float32.

    params are in PyTorch orientation:
      w_in (hidden, in_features), b_in (hidden,),
      w_cell (hidden, hidden)  [shared RNNCell W_ih],
      b_cell (hidden,)         [b_ih + b_hh combined],
      w_out (ny, hidden), b_out (ny,).
    """
    w_in, b_in, w_cell, b_cell, w_out, b_out = params
    nt, ngrid, nxf = x.shape
    assert nxf == nx
    hidden = w_in.shape[0]
    nxe = nx - ny
    max_delay = max(input_delay, feedback_delay)
    assert nt > max_delay
    t_eff = nt - max_delay
    R = t_eff * ngrid                    # number of predicted rows
    D = max_delay * ngrid                # delay-halo width in columns
    D_pad = _round_up(D, 128)

    # ---- fold the delay-window concat into the linearIn weight -------------
    # One (hidden, nx) slice per distinct offset; duplicate "-1" slots summed,
    # exogenous/feedback merged, inactive (feature, offset) pairs zero.  This
    # must follow the PyTorch concat / column order exactly.
    groups = [(0, nxe, -1)]
    groups += [(0, nxe, -input_delay + i) for i in range(input_delay)]
    groups += [(nxe, nx, -1)]
    groups += [(nxe, nx, -feedback_delay + i) for i in range(feedback_delay)]
    w_eff = jnp.zeros((max_delay, hidden, nx), jnp.float32)
    col = 0
    for flo, fhi, off in groups:
        w = fhi - flo
        w_eff = w_eff.at[max_delay + off, :, flo:fhi].add(w_in[:, col:col + w])
        col += w
    assert col == w_in.shape[1]

    # ---- pick the lane-block size -------------------------------------------
    # Biggest multiple of D_pad up to block_n (fewer, bigger grid steps; the
    # ~0.35us/step overhead is what hurts at small tiles).  Then nudge to an
    # even step count so v7x's two TensorCores stay balanced; harmless on the
    # single-TC v5e/v6e.
    B = max(D_pad, _round_up(min(block_n, _round_up(R, 128)), D_pad))
    G = _cdiv(R, B)
    if G > 1 and G % 2 == 1:
        B2 = max(D_pad, _round_up(_cdiv(R, G + 1), D_pad))
        if _cdiv(R, B2) % 2 == 0:
            B, G = B2, _cdiv(R, B2)
    wpad = G * B + D_pad
    halo_step = B // D_pad               # B is a multiple of D_pad by construction

    # ---- single-shot lane-dense layout pass ---------------------------------
    # x_flat[f, t*ngrid + g] = x[t, g, f];  transpose + tail zero-pad fuse under
    # jit into one pass over x.
    # TODO(synk): cache x_flat across calls when x is reused in a training loop.
    x_t = jnp.transpose(x, (2, 0, 1)).reshape(nx, nt * ngrid).astype(compute_dtype)
    x_flat = jnp.pad(x_t, ((0, 0), (0, wpad - nt * ngrid)))

    w_eff_c = w_eff.astype(compute_dtype)
    w_cell_c = w_cell.astype(compute_dtype)
    w_out_c = w_out.astype(compute_dtype)
    b_in_c = b_in.reshape(hidden, 1).astype(jnp.float32)
    b_cell_c = b_cell.reshape(hidden, 1).astype(jnp.float32)
    b_out_c = b_out.reshape(ny, 1).astype(jnp.float32)

    kernel = partial(_narx_kernel, max_delay, ngrid, num_layers, B, compute_dtype)

    in_specs = [
        pl.BlockSpec((nx, B), lambda i: (0, i)),                        # x base
        pl.BlockSpec((nx, D_pad), lambda i: (0, (i + 1) * halo_step)),  # x halo
        pl.BlockSpec((max_delay, hidden, nx), lambda i: (0, 0, 0)),     # w_eff
        pl.BlockSpec((hidden, 1), lambda i: (0, 0)),                    # b_in
        pl.BlockSpec((hidden, hidden), lambda i: (0, 0)),               # w_cell
        pl.BlockSpec((hidden, 1), lambda i: (0, 0)),                    # b_cell
        pl.BlockSpec((ny, hidden), lambda i: (0, 0)),                   # w_out
        pl.BlockSpec((ny, 1), lambda i: (0, 0)),                        # b_out
    ]

    # Explicit VMEM budget: double-buffered x base/halo + output block, the
    # (once-fetched) weights, and the live (hidden, B) f32 intermediates, with
    # generous headroom; clamped to stay inside v7x's 64 MiB physical VMEM.
    bytes_c = jnp.finfo(compute_dtype).bits // 8
    vmem_est = (2 * nx * (B + D_pad) * bytes_c
                + 2 * ny * B * 4
                + 2 * (max_delay * nx + hidden + ny) * hidden * bytes_c
                + 2 * (2 * hidden + ny) * 4
                + 8 * hidden * B * 4)
    vmem_limit = int(min(64 * 1024 * 1024, max(16 * 1024 * 1024, 4 * vmem_est)))

    out_rows = pl.pallas_call(
        kernel,
        out_shape=jax.ShapeDtypeStruct((ny, G * B), jnp.float32),
        grid=(G,),
        in_specs=in_specs,
        out_specs=pl.BlockSpec((ny, B), lambda i: (0, i)),
        compiler_params=pltpu.CompilerParams(
            dimension_semantics=("parallel",),
            vmem_limit_bytes=vmem_limit),
    )(x_flat, x_flat, w_eff_c, b_in_c, w_cell_c, b_cell_c, w_out_c, b_out_c)

    # Tail columns (beyond R) were computed from zero padding; slice them off.
    y = out_rows[:, :R].reshape(ny, t_eff, ngrid).transpose(1, 2, 0)
    head = x[:max_delay, :, nxe:].astype(jnp.float32)
    return jnp.concatenate([head, y], axis=0)


def narx_reference(x, params, *, nx, ny, input_delay, feedback_delay, num_layers):
    """Pure-JAX transliteration of the PyTorch forward (open loop)."""
    w_in, b_in, w_cell, b_cell, w_out, b_out = params
    nt, ngrid, _ = x.shape
    max_delay = max(input_delay, feedback_delay)
    out = jnp.zeros((nt, ngrid, ny), jnp.float32)
    out = out.at[:max_delay].set(x[:max_delay, :, nx - ny:])
    for t in range(max_delay, nt):
        x0 = x[t - input_delay:t, :, : nx - ny]
        x0_t = x0[-1]
        for i in range(input_delay):
            x0_t = jnp.concatenate([x0_t, x0[i]], axis=-1)
        y0 = x[t - feedback_delay:t, :, nx - ny:]
        y0_t = y0[-1]
        for i in range(feedback_delay):
            y0_t = jnp.concatenate([y0_t, y0[i]], axis=-1)
        xt = jnp.concatenate([x0_t, y0_t], axis=-1)
        h = jnp.maximum(xt @ w_in.T + b_in, 0.0)
        for _ in range(num_layers):
            h = jnp.tanh(h @ w_cell.T + b_cell)
        out = out.at[t].set(h @ w_out.T + b_out)
    return out


if __name__ == "__main__":
    # Small, deterministic configuration.
    nt, ngrid = 16, 8
    nx, ny = 6, 2                 # n_input_features, n_output_features
    hidden = 32                   # n_hidden_states
    input_delay, feedback_delay = 2, 3
    num_layers = 4
    in_features = (nx - ny) * (input_delay + 1) + ny * (feedback_delay + 1)

    key = jax.random.PRNGKey(0)
    kx, k1, k2, k3, k4, k5, k6 = jax.random.split(key, 7)

    x = jax.random.normal(kx, (nt, ngrid, nx), dtype=jnp.float32)

    # Deterministic synthetic parameters in PyTorch orientation.
    w_in = 0.1 * jax.random.normal(k1, (hidden, in_features), dtype=jnp.float32)
    b_in = 0.1 * jax.random.normal(k2, (hidden,), dtype=jnp.float32)
    w_cell = 0.1 * jax.random.normal(k3, (hidden, hidden), dtype=jnp.float32)  # shared RNNCell W_ih
    b_cell = 0.1 * jax.random.normal(k4, (hidden,), dtype=jnp.float32)         # b_ih + b_hh combined
    w_out = 0.1 * jax.random.normal(k5, (ny, hidden), dtype=jnp.float32)
    b_out = 0.1 * jax.random.normal(k6, (ny,), dtype=jnp.float32)
    params = (w_in, b_in, w_cell, b_cell, w_out, b_out)

    cfg = dict(nx=nx, ny=ny, input_delay=input_delay,
               feedback_delay=feedback_delay, num_layers=num_layers)

    ref = narx_reference(x, params, **cfg)

    # f32 path: tight check.
    out = jax.block_until_ready(narx_forward(x, params, **cfg))
    assert out.shape == (nt, ngrid, ny)
    assert jnp.allclose(out, ref, atol=1e-5, rtol=1e-5), "f32 mismatch vs reference"

    # bf16 storage / matmul / tanh path (halves x HBM traffic and uses the
    # faster bf16 EUP on v6e/v7x; f32 MXU accumulation kept): loose check.
    out_bf16 = jax.block_until_ready(
        narx_forward(x, params, compute_dtype=jnp.bfloat16, **cfg))
    assert jnp.allclose(out_bf16, ref, atol=5e-2, rtol=5e-2), "bf16 mismatch vs reference"

    print("KERNEL_OK")
</pallas_src>

<mosaic_0001>
module attributes {stable_mosaic.version = 11 : i64} {
  func.func @_narx_kernel(%arg0: i32, %arg1: memref<6x128xf32, #tpu.memory_space<vmem>>, %arg2: memref<6x128xf32, #tpu.memory_space<vmem>>, %arg3: memref<3x32x6xf32, #tpu.memory_space<vmem>>, %arg4: memref<32x1xf32, #tpu.memory_space<vmem>>, %arg5: memref<32x32xf32, #tpu.memory_space<vmem>>, %arg6: memref<32x1xf32, #tpu.memory_space<vmem>>, %arg7: memref<2x32xf32, #tpu.memory_space<vmem>>, %arg8: memref<2x1xf32, #tpu.memory_space<vmem>>, %arg9: memref<2x128xf32, #tpu.memory_space<vmem>>) attributes {dimension_semantics = [#tpu.dimension_semantics<parallel>], iteration_bounds = array<i64: 1>, scalar_prefetch = 0 : i64, scratch_operands = 0 : i64, tpu.core_type = #tpu.core_type<tc>, window_params = [{transform_indices = @transform_0, window_bounds = array<i64: 6, 128>}, {transform_indices = @transform_1, window_bounds = array<i64: 6, 128>}, {pipeline_mode = #tpu.pipeline_mode<synchronous>, transform_indices = @transform_2, window_bounds = array<i64: 3, 32, 6>}, {pipeline_mode = #tpu.pipeline_mode<synchronous>, transform_indices = @transform_3, window_bounds = array<i64: 32, 1>}, {pipeline_mode = #tpu.pipeline_mode<synchronous>, transform_indices = @transform_4, window_bounds = array<i64: 32, 32>}, {pipeline_mode = #tpu.pipeline_mode<synchronous>, transform_indices = @transform_5, window_bounds = array<i64: 32, 1>}, {pipeline_mode = #tpu.pipeline_mode<synchronous>, transform_indices = @transform_6, window_bounds = array<i64: 2, 32>}, {pipeline_mode = #tpu.pipeline_mode<synchronous>, transform_indices = @transform_7, window_bounds = array<i64: 2, 1>}, {transform_indices = @transform_8, window_bounds = array<i64: 2, 128>}]} {
    %c0 = arith.constant 0 : index
    %c0_0 = arith.constant 0 : index
    %0 = vector.load %arg1[%c0, %c0_0] : memref<6x128xf32, #tpu.memory_space<vmem>>, vector<6x128xf32>
    %c0_1 = arith.constant 0 : index
    %c0_2 = arith.constant 0 : index
    %c0_3 = arith.constant 0 : index
    %1 = vector.load %arg3[%c0_1, %c0_2, %c0_3] : memref<3x32x6xf32, #tpu.memory_space<vmem>>, vector<1x32x6xf32>
    %2 = vector.shape_cast %1 : vector<1x32x6xf32> to vector<32x6xf32>
    %cst = arith.constant dense<0.000000e+00> : vector<32x128xf32>
    %3 = tpu.matmul %2, %0, %cst {dimension_numbers = #tpu.dot_dimension_numbers<[1], [0], [0], [1], [0, 0, 1, 1], [], []>} : vector<32x6xf32>, vector<6x128xf32>, vector<32x128xf32> -> vector<32x128xf32>
    %c0_4 = arith.constant 0 : index
    %c0_5 = arith.constant 0 : index
    %4 = vector.load %arg2[%c0_4, %c0_5] : memref<6x128xf32, #tpu.memory_space<vmem>>, vector<6x128xf32>
    %5 = tpu.concatenate %0, %4 in 1 : vector<6x128xf32>, vector<6x128xf32> -> vector<6x256xf32>
    %c1 = arith.constant 1 : index
    %c0_6 = arith.constant 0 : index
    %c0_7 = arith.constant 0 : index
    %6 = vector.load %arg3[%c1, %c0_6, %c0_7] : memref<3x32x6xf32, #tpu.memory_space<vmem>>, vector<1x32x6xf32>
    %7 = vector.shape_cast %6 : vector<1x32x6xf32> to vector<32x6xf32>
    %8 = vector.extract_strided_slice %5 {offsets = [0, 8], sizes = [6, 128], strides = [1, 1]} : vector<6x256xf32> to vector<6x128xf32>
    %cst_8 = arith.constant dense<0.000000e+00> : vector<32x128xf32>
    %9 = tpu.matmul %7, %8, %cst_8 {dimension_numbers = #tpu.dot_dimension_numbers<[1], [0], [0], [1], [0, 0, 1, 1], [], []>} : vector<32x6xf32>, vector<6x128xf32>, vector<32x128xf32> -> vector<32x128xf32>
    %10 = arith.addf %3, %9 : vector<32x128xf32>
    %c2 = arith.constant 2 : index
    %c0_9 = arith.constant 0 : index
    %c0_10 = arith.constant 0 : index
    %11 = vector.load %arg3[%c2, %c0_9, %c0_10] : memref<3x32x6xf32, #tpu.memory_space<vmem>>, vector<1x32x6xf32>
    %12 = vector.shape_cast %11 : vector<1x32x6xf32> to vector<32x6xf32>
    %13 = vector.extract_strided_slice %5 {offsets = [0, 16], sizes = [6, 128], strides = [1, 1]} : vector<6x256xf32> to vector<6x128xf32>
    %cst_11 = arith.constant dense<0.000000e+00> : vector<32x128xf32>
    %14 = tpu.matmul %12, %13, %cst_11 {dimension_numbers = #tpu.dot_dimension_numbers<[1], [0], [0], [1], [0, 0, 1, 1], [], []>} : vector<32x6xf32>, vector<6x128xf32>, vector<32x128xf32> -> vector<32x128xf32>
    %15 = arith.addf %10, %14 : vector<32x128xf32>
    %c0_12 = arith.constant 0 : index
    %c0_13 = arith.constant 0 : index
    %16 = vector.load %arg4[%c0_12, %c0_13] : memref<32x1xf32, #tpu.memory_space<vmem>>, vector<32x1xf32>
    %17 = vector.broadcast %16 : vector<32x1xf32> to vector<32x128xf32>
    %18 = arith.addf %15, %17 : vector<32x128xf32>
    %cst_14 = arith.constant 0.000000e+00 : f32
    %19 = vector.broadcast %cst_14 : f32 to vector<32x128xf32>
    %20 = arith.maximumf %18, %19 : vector<32x128xf32>
    %c0_15 = arith.constant 0 : index
    %c0_16 = arith.constant 0 : index
    %21 = vector.load %arg5[%c0_15, %c0_16] : memref<32x32xf32, #tpu.memory_space<vmem>>, vector<32x32xf32>
    %c0_17 = arith.constant 0 : index
    %c0_18 = arith.constant 0 : index
    %22 = vector.load %arg6[%c0_17, %c0_18] : memref<32x1xf32, #tpu.memory_space<vmem>>, vector<32x1xf32>
    %cst_19 = arith.constant dense<0.000000e+00> : vector<32x128xf32>
    %23 = tpu.matmul %21, %20, %cst_19 {dimension_numbers = #tpu.dot_dimension_numbers<[1], [0], [0], [1], [0, 0, 1, 1], [], []>} : vector<32x32xf32>, vector<32x128xf32>, vector<32x128xf32> -> vector<32x128xf32>
    %24 = vector.broadcast %22 : vector<32x1xf32> to vector<32x128xf32>
    %25 = arith.addf %23, %24 : vector<32x128xf32>
    %26 = math.tanh %25 : vector<32x128xf32>
    %cst_20 = arith.constant dense<0.000000e+00> : vector<32x128xf32>
    %27 = tpu.matmul %21, %26, %cst_20 {dimension_numbers = #tpu.dot_dimension_numbers<[1], [0], [0], [1], [0, 0, 1, 1], [], []>} : vector<32x32xf32>, vector<32x128xf32>, vector<32x128xf32> -> vector<32x128xf32>
    %28 = vector.broadcast %22 : vector<32x1xf32> to vector<32x128xf32>
    %29 = arith.addf %27, %28 : vector<32x128xf32>
    %30 = math.tanh %29 : vector<32x128xf32>
    %cst_21 = arith.constant dense<0.000000e+00> : vector<32x128xf32>
    %31 = tpu.matmul %21, %30, %cst_21 {dimension_numbers = #tpu.dot_dimension_numbers<[1], [0], [0], [1], [0, 0, 1, 1], [], []>} : vector<32x32xf32>, vector<32x128xf32>, vector<32x128xf32> -> vector<32x128xf32>
    %32 = vector.broadcast %22 : vector<32x1xf32> to vector<32x128xf32>
    %33 = arith.addf %31, %32 : vector<32x128xf32>
    %34 = math.tanh %33 : vector<32x128xf32>
    %cst_22 = arith.constant dense<0.000000e+00> : vector<32x128xf32>
    %35 = tpu.matmul %21, %34, %cst_22 {dimension_numbers = #tpu.dot_dimension_numbers<[1], [0], [0], [1], [0, 0, 1, 1], [], []>} : vector<32x32xf32>, vector<32x128xf32>, vector<32x128xf32> -> vector<32x128xf32>
    %36 = vector.broadcast %22 : vector<32x1xf32> to vector<32x128xf32>
    %37 = arith.addf %35, %36 : vector<32x128xf32>
    %38 = math.tanh %37 : vector<32x128xf32>
    %c0_23 = arith.constant 0 : index
    %c0_24 = arith.constant 0 : index
    %39 = vector.load %arg7[%c0_23, %c0_24] : memref<2x32xf32, #tpu.memory_space<vmem>>, vector<2x32xf32>
    %cst_25 = arith.constant dense<0.000000e+00> : vector<2x128xf32>
    %40 = tpu.matmul %39, %38, %cst_25 {dimension_numbers = #tpu.dot_dimension_numbers<[1], [0], [0], [1], [0, 0, 1, 1], [], []>} : vector<2x32xf32>, vector<32x128xf32>, vector<2x128xf32> -> vector<2x128xf32>
    %c0_26 = arith.constant 0 : index
    %c0_27 = arith.constant 0 : index
    %41 = vector.load %arg8[%c0_26, %c0_27] : memref<2x1xf32, #tpu.memory_space<vmem>>, vector<2x1xf32>
    %42 = vector.broadcast %41 : vector<2x1xf32> to vector<2x128xf32>
    %43 = arith.addf %40, %42 : vector<2x128xf32>
    %c0_28 = arith.constant 0 : index
    %c0_29 = arith.constant 0 : index
    %44 = vector.load %arg9[%c0_28, %c0_29] : memref<2x128xf32, #tpu.memory_space<vmem>>, vector<2x128xf32>
    tpu.vector_store %arg9[%c0_28, %c0_29], %43 {strides = array<i32>} : memref<2x128xf32, #tpu.memory_space<vmem>>, vector<2x128xf32>,
    return
  }
  func.func @transform_0(%arg0: i32) -> (i32, i32) {
    %c0_i32 = arith.constant 0 : i32
    %c0_i32_0 = arith.constant 0 : i32
    return %c0_i32, %arg0 : i32, i32
  }
  func.func @transform_1(%arg0: i32) -> (i32, i32) {
    %c1_i32 = arith.constant 1 : i32
    %0 = arith.addi %arg0, %c1_i32 : i32
    %c1_i32_0 = arith.constant 1 : i32
    %1 = arith.muli %0, %c1_i32_0 : i32
    %c0_i32 = arith.constant 0 : i32
    %c0_i32_1 = arith.constant 0 : i32
    return %c0_i32, %1 : i32, i32
  }
  func.func @transform_2(%arg0: i32) -> (i32, i32, i32) {
    %c0_i32 = arith.constant 0 : i32
    %c0_i32_0 = arith.constant 0 : i32
    %c0_i32_1 = arith.constant 0 : i32
    %c0_i32_2 = arith.constant 0 : i32
    return %c0_i32, %c0_i32_0, %c0_i32_1 : i32, i32, i32
  }
  func.func @transform_3(%arg0: i32) -> (i32, i32) {
    %c0_i32 = arith.constant 0 : i32
    %c0_i32_0 = arith.constant 0 : i32
    %c0_i32_1 = arith.constant 0 : i32
    return %c0_i32, %c0_i32_0 : i32, i32
  }
  func.func @transform_4(%arg0: i32) -> (i32, i32) {
    %c0_i32 = arith.constant 0 : i32
    %c0_i32_0 = arith.constant 0 : i32
    %c0_i32_1 = arith.constant 0 : i32
    return %c0_i32, %c0_i32_0 : i32, i32
  }
  func.func @transform_5(%arg0: i32) -> (i32, i32) {
    %c0_i32 = arith.constant 0 : i32
    %c0_i32_0 = arith.constant 0 : i32
    %c0_i32_1 = arith.constant 0 : i32
    return %c0_i32, %c0_i32_0 : i32, i32
  }
  func.func @transform_6(%arg0: i32) -> (i32, i32) {
    %c0_i32 = arith.constant 0 : i32
    %c0_i32_0 = arith.constant 0 : i32
    %c0_i32_1 = arith.constant 0 : i32
    return %c0_i32, %c0_i32_0 : i32, i32
  }
  func.func @transform_7(%arg0: i32) -> (i32, i32) {
    %c0_i32 = arith.constant 0 : i32
    %c0_i32_0 = arith.constant 0 : i32
    %c0_i32_1 = arith.constant 0 : i32
    return %c0_i32, %c0_i32_0 : i32, i32
  }
  func.func @transform_8(%arg0: i32) -> (i32, i32) {
    %c0_i32 = arith.constant 0 : i32
    %c0_i32_0 = arith.constant 0 : i32
    return %c0_i32, %arg0 : i32, i32
  }
}

</mosaic_0001>

<bundles_post_ra>
// kernel: narx_forward.1
= control target key start
LH: loop header
LB: loop body
LE: loop exit
PB: predicated region body
PF: predicated region fallthrough
CT: control target
= control target key end

     0   :  { %vm78_vm0 = vcmask 1045504   ;;  %vm65_vm1 = vcmask 48128   ;;  %s1122_s9 = smov 112   ;;  %s1123_s10 = smov 120   ;;  %v1124_v7 = vmov 0   ;;  %vm274_vm2 = vcmask 916480   ;;  %s1342_s0 = inlined_call_operand.vmem [shape: f32[6,256], index: 0, kind: input, shape index: {}, may-alias: {0,1}]   ;;  %s1343_s1 = inlined_call_operand.vmem [shape: f32[6,256], index: 1, kind: input, shape index: {}, may-alias: {0,1}]   ;;  %s1344_s2 = inlined_call_operand.vmem [shape: f32[3,32,6], index: 2, kind: input, shape index: {}]   ;;  %s1345_s3 = inlined_call_operand.vmem [shape: f32[32,1], index: 3, kind: input, shape index: {}]   ;;  %s1346_s5 = inlined_call_operand.vmem [shape: f32[32,1], index: 5, kind: input, shape index: {}]   ;;  %s1347_s7 = inlined_call_operand.vmem [shape: f32[2,1], index: 7, kind: input, shape index: {}]   ;;  %s1348_s4 = inlined_call_operand.vmem [shape: f32[32,32], index: 4, kind: input, shape index: {}]   ;;  %s1349_s6 = inlined_call_operand.vmem [shape: f32[2,32], index: 6, kind: input, shape index: {}]   ;;  %s1350_s8 = inlined_call_operand.vmem [shape: f32[2,128], index: 8, kind: output, shape index: {}]  }
   0x1   :  { %v46_v0 = vld [vmem:[%s1342_s0] sm:$0x3f]  ;;  %v899_v3 = vld [vmem:[%s1343_s1 + $0x8] sm:$0x3f]  ;;  %v49_v5 = vld [vmem:[%s1344_s2 + $0x10] sm:$0xff]  ;;  %1089 = vset.pattern.permute.xlu1 %v1124_v7  ;;  %1088 = vset.pattern.permute.xlu0 %v1124_v7  ;;  %vm63_vm3 = vcmask 982016  }
   0x2   :  { %v900_v1 = vld [vmem:[%s1344_s2 + $0x20] sm:$0xff]  ;;  %270 = vrot.lane.b32.xlu1 %v46_v0, %s1122_s9  ;;  %59 = vrot.lane.b32.xlu0 %v46_v0, %s1123_s10  ;;  %v48_v4 = vld [vmem:[%s1344_s2 + $0x8] sm:$0xff]  ;;  %vm439_vm4 = vcmask 261120   ;;  %vm1126_vm5 = vmmov 0  }
   0x3   :  { %v47_v2 = vld [vmem:[%s1344_s2] sm:$0xff]  ;;  %1000 = vmatprep.subr.msk.mxu1 %vm78_vm0, %v46_v0  ;;  %994 = vmatprep.mubr.msk.f32.mxu0 %vm65_vm1, %v900_v1  ;;  %v50_v6 = vld [vmem:[%s1344_s2 + $0x18] sm:$0xff]  ;;  %v381_v8 = vld [vmem:[%s1345_s3 + $0x10] sm:$0xff] }
   0x4   :  { %1001 = vmatpush3.msk.msra.mxu1 %vm78_vm0, %v46_v0  ;;  %1002 = vmatprep.mubr.msk.f32.mxu1 %vm65_vm1, %v47_v2  ;;  %v382_v9 = vld [vmem:[%s1345_s3 + $0x18] sm:$0xff]  ;;  %v380_v10 = vld [vmem:[%s1345_s3 + $0x8] sm:$0xff]  ;;  %v379_v11 = vld [vmem:[%s1345_s3] sm:$0xff] }
   0x5   :  { %1003 = vmatmul.mubr.msk.f32.vlgmr.msra.gmra.mxu1 %vm65_vm1, %v48_v4  ;;  %v418_v12 = vld [vmem:[%s1346_s5 + $0x18] sm:$0xff]  ;;  %v417_v13 = vld [vmem:[%s1346_s5 + $0x10] sm:$0xff]  ;;  %v416_v14 = vld [vmem:[%s1346_s5 + $0x8] sm:$0xff] }
   0x6   :  { %272 = vrot.lane.b32.xlu1 %v899_v3, %s1122_s9  ;;  %61 = vrot.lane.b32.xlu0 %v899_v3, %s1123_s10  ;;  %v415_v15 = vld [vmem:[%s1346_s5] sm:$0xff]  ;;  %v901_v23 = vld [vmem:[%s1344_s2 + $0x28] sm:$0xff] }
   0x7   :  { %1005 = vmatprep.mubr.msk.f32.mxu1 %vm65_vm1, %v49_v5  ;;  %v809_v16 = vld [vmem:[%s1347_s7] sm:$0x3]  ;;  %v902_v24 = vld [vmem:[%s1344_s2 + $0x30] sm:$0xff]  ;;  %v903_v25 = vld [vmem:[%s1344_s2 + $0x38] sm:$0xff] }
   0x8   :  { %v914_v26 = vld [vmem:[%s1344_s2 + $0x40] sm:$0xff]  ;;  %v915_v27 = vld [vmem:[%s1344_s2 + $0x48] sm:$0xff]  ;;  %v916_v28 = vld [vmem:[%s1344_s2 + $0x50] sm:$0xff] }
   0x9   :  { %1006 = vmatmul.mubr.msk.f32.gmra.mxu1 %vm65_vm1, %v50_v6  ;;  %v917_v29 = vld [vmem:[%s1344_s2 + $0x58] sm:$0xff]  ;;  %v1262_v30 = vld [vmem:[%s1348_s4] sm:$0xff]  ;;  %v1271_v63 = vld [vmem:[%s1348_s4 + $0x8] sm:$0xff] }
   0xa   :  { %395 = vperm.xlu1 %1089, %v381_v8   ;;  %400 = vperm.xlu0 %1088, %v382_v9   ;;  %v1276_v0 = vld [vmem:[%s1348_s4 + $0x10] sm:$0xff]  ;;  %v1285_v1 = vld [vmem:[%s1348_s4 + $0x18] sm:$0xff] }
   0xb   :  { %1024 = vmatprep.mubr.msk.f32.mxu1 %vm439_vm4, %v1262_v30 }
   0xe   :  { %390 = vperm.xlu1 %1089, %v380_v10   ;;  %385 = vperm.xlu0 %1088, %v379_v11  }
  0x12   :  { %436 = vperm.xlu1 %1089, %v418_v12   ;;  %431 = vperm.xlu0 %1088, %v417_v13  }
  0x16   :  { %426 = vperm.xlu1 %1089, %v416_v14   ;;  %421 = vperm.xlu0 %1088, %v415_v15  }
  0x1a   :  { %812 = vperm.xlu1 %1089, %v809_v16  }
  0x74   :  { %v271_v17 = vpop.permute.xlu1 %270  ;;  %v60_v18 = vpop.permute.xlu0 %59 }
  0x78   :  { %v273_v19 = vpop.permute.xlu1 %272  ;;  %v62_v20 = vpop.permute.xlu0 %61 }
  0x79   :  { %v275_v21 = vsel %vm274_vm2, %v271_v17, %v273_v19  ;;  %v64_v22 = vsel %vm63_vm3, %v60_v18, %v62_v20 }
  0x7a   :  { %992 = vmatprep.subr.msk.mxu0 %vm78_vm0, %v64_v22 }
  0x7b   :  { %993 = vmatpush3.msk.msra.mxu0 %vm78_vm0, %v64_v22 }
  0x7c   :  { %995 = vmatmul.mubr.msk.f32.vlgmr.msra.gmra.mxu0 %vm65_vm1, %v901_v23  ;;  %1008 = vmatprep.subr.msk.mxu0 %vm78_vm0, %v275_v21 }
  0x7d   :  { %1009 = vmatpush3.msk.msra.mxu0 %vm78_vm0, %v275_v21  ;;  %997 = vmatprep.mubr.msk.f32.mxu0 %vm65_vm1, %v902_v24 }
  0x80   :  { %998 = vmatmul.mubr.msk.f32.gmra.mxu0 %vm65_vm1, %v903_v25 }
  0x81   :  { %1010 = vmatprep.mubr.msk.f32.mxu0 %vm65_vm1, %v914_v26 }
  0x84   :  { %1011 = vmatmul.mubr.msk.f32.vlgmr.msra.gmra.mxu0 %vm65_vm1, %v915_v27 }
  0x85   :  { %1013 = vmatprep.mubr.msk.f32.mxu0 %vm65_vm1, %v916_v28  ;;  %v396_v39 = vpop.permute.xlu1 %395  ;;  %v401_v44 = vpop.permute.xlu0 %400 }
  0x88   :  { %1014 = vmatmul.mubr.msk.f32.gmra.mxu0 %vm65_vm1, %v917_v29 }
  0x89   :  { %1038 = vmatprep.mubr.msk.f32.mxu0 %vm439_vm4, %v1262_v30  ;;  %v391_v54 = vpop.permute.xlu1 %390  ;;  %v386_v58 = vpop.permute.xlu0 %385 }
  0x8d   :  { %v1291_v2 = vpop.permute.xlu1 %436  ;;  %v1293_v4 = vpop.permute.xlu0 %431 }
  0x91   :  { %v1296_v8 = vpop.permute.xlu1 %426  ;;  %v1300_v12 = vpop.permute.xlu0 %421 }
  0xc5   :  { %v1004_v31 = vpop.f32.mrf.mxu1 }
  0xc7   :  { %v246_v34 = vpop.f32.mrf.mxu1 }
  0xc9   :  { %v1007_v36 = vpop.f32.mrf.mxu1 }
  0xcb   :  { %v256_v40 = vpop.f32.mrf.mxu1 }
 0x13c   :  { %v996_v32 = vpop.f32.mrf.mxu0 }
 0x13d   :  { %v252_v42 = vadd.f32 %v1004_v31, %v996_v32 }
 0x13e   :  { %v147_v33 = vpop.f32.mrf.mxu0 }
 0x13f   :  { %v247_v46 = vadd.f32 %v246_v34, %v147_v33 }
 0x140   :  { %v999_v35 = vpop.f32.mrf.mxu0 }
 0x141   :  { %v262_v43 = vadd.f32 %v1007_v36, %v999_v35 }
 0x142   :  { %v157_v37 = vpop.f32.mrf.mxu0 }
 0x143   :  { %v257_v47 = vadd.f32 %v256_v40, %v157_v37 }
 0x144   :  { %v1012_v38 = vpop.f32.mrf.mxu0 }
 0x145   :  { %v376_v48 = vadd.f32 %v1012_v38, %v252_v42  ;;  %v1125_v42 = vmov 0.0  }
 0x146   :  { %v356_v41 = vpop.f32.mrf.mxu0 }
 0x147   :  { %v375_v51 = vadd.f32 %v356_v41, %v247_v46  ;;  %v404_v55 = vadd.f32 %v391_v54, %v376_v48  ;;  %v808_v54 = vld [vmem:[%s1349_s6] sm:$0x3] }
 0x148   :  { %v1015_v45 = vpop.f32.mrf.mxu0 }
 0x149   :  { %v378_v49 = vadd.f32 %v1015_v45, %v262_v43  ;;  %v403_v59 = vadd.f32 %v386_v58, %v375_v51  ;;  %v408_v61 = vmax.f32 %v404_v55, 0.0 }
 0x14a   :  { %v366_v50 = vpop.f32.mrf.mxu0 }
 0x14b   :  { %v406_v52 = vadd.f32 %v401_v44, %v378_v49  ;;  %v377_v53 = vadd.f32 %v366_v50, %v257_v47  ;;  %v407_v62 = vmax.f32 %v403_v59, 0.0 }
 0x14d   :  { %v410_v56 = vmax.f32 %v406_v52, 0.0  ;;  %v405_v57 = vadd.f32 %v396_v39, %v377_v53 }
 0x14f   :  { %v409_v60 = vmax.f32 %v405_v57, 0.0  ;;  %1016 = vmatprep.subr.mxu1 %v410_v56 }
 0x150   :  { %1017 = vmatpush3.msra.mxu1 %v410_v56  ;;  %v813_v56 = vpop.permute.xlu1 %812 }
 0x151   :  { %1018 = vmatprep.subr.mxu1 %v409_v60 }
 0x152   :  { %1019 = vmatpush3.msra.mxu1 %v409_v60 }
 0x153   :  { %1020 = vmatprep.subr.mxu1 %v408_v61 }
 0x154   :  { %1021 = vmatpush3.msra.mxu1 %v408_v61 }
 0x155   :  { %1022 = vmatprep.subr.mxu1 %v407_v62 }
 0x156   :  { %1023 = vmatpush3.msra.mxu1 %v407_v62 }
 0x157   :  { %1025 = vmatmul.mubr.msk.f32.vlgmr.msra.gmra.mxu1 %vm439_vm4, %v1271_v63 }
 0x158   :  { %1027 = vmatprep.mubr.msk.f32.mxu1 %vm439_vm4, %v1276_v0 }
 0x15b   :  { %1028 = vmatmul.mubr.msk.f32.gmra.mxu1 %vm439_vm4, %v1285_v1 }
 0x15c   :  { %1052 = vmatprep.mubr.msk.f32.mxu1 %vm439_vm4, %v1262_v30 }
 0x217   :  { %v1026_v3 = vpop.f32.mrf.mxu1 }
 0x218   :  { %v524_v10 = vadd.f32 %v1026_v3, %v1296_v8 }
 0x219   :  { %v518_v5 = vpop.f32.mrf.mxu1 }
 0x21a   :  { %v519_v13 = vadd.f32 %v518_v5, %v1300_v12 }
 0x21b   :  { %v1029_v6 = vpop.f32.mrf.mxu1 }
 0x21c   :  { %v534_v7 = vadd.f32 %v1029_v6, %v1291_v2 }
 0x21d   :  { %v528_v9 = vpop.f32.mrf.mxu1 }
 0x21e   :  { %1090 = vtanh.f32 %v534_v7  ;;  %v529_v11 = vadd.f32 %v528_v9, %v1293_v4 }
 0x220   :  { %1092 = vtanh.f32 %v529_v11 }
 0x221   :  { %1094 = vtanh.f32 %v524_v10 }
 0x222   :  { %1096 = vtanh.f32 %v519_v13 }
 0x22b   :  { %v1091_v14 = vpop.eup %1090 }
 0x22c   :  { %1030 = vmatprep.subr.mxu0 %v1091_v14 }
 0x22d   :  { %v1093_v15 = vpop.eup %1092  ;;  %1031 = vmatpush3.msra.mxu0 %v1091_v14 }
 0x22e   :  { %1032 = vmatprep.subr.mxu0 %v1093_v15  ;;  %v1095_v16 = vpop.eup %1094 }
 0x22f   :  { %1033 = vmatpush3.msra.mxu0 %v1093_v15  ;;  %v1097_v17 = vpop.eup %1096 }
 0x230   :  { %1034 = vmatprep.subr.mxu0 %v1095_v16 }
 0x231   :  { %1035 = vmatpush3.msra.mxu0 %v1095_v16 }
 0x232   :  { %1036 = vmatprep.subr.mxu0 %v1097_v17 }
 0x233   :  { %1037 = vmatpush3.msra.mxu0 %v1097_v17 }
 0x234   :  { %1039 = vmatmul.mubr.msk.f32.vlgmr.msra.gmra.mxu0 %vm439_vm4, %v1271_v63 }
 0x235   :  { %1041 = vmatprep.mubr.msk.f32.mxu0 %vm439_vm4, %v1276_v0 }
 0x238   :  { %1042 = vmatmul.mubr.msk.f32.gmra.mxu0 %vm439_vm4, %v1285_v1 }
 0x239   :  { %1066 = vmatprep.mubr.msk.f32.mxu0 %vm439_vm4, %v1262_v30 }
 0x2f4   :  { %v1040_v18 = vpop.f32.mrf.mxu0 }
 0x2f5   :  { %v613_v23 = vadd.f32 %v1040_v18, %v1296_v8 }
 0x2f6   :  { %v607_v19 = vpop.f32.mrf.mxu0 }
 0x2f7   :  { %v608_v25 = vadd.f32 %v607_v19, %v1300_v12 }
 0x2f8   :  { %v1043_v20 = vpop.f32.mrf.mxu0 }
 0x2f9   :  { %v623_v21 = vadd.f32 %v1043_v20, %v1291_v2 }
 0x2fa   :  { %v617_v22 = vpop.f32.mrf.mxu0 }
 0x2fb   :  { %1098 = vtanh.f32 %v623_v21  ;;  %v618_v24 = vadd.f32 %v617_v22, %v1293_v4 }
 0x2fd   :  { %1100 = vtanh.f32 %v618_v24 }
 0x2fe   :  { %1102 = vtanh.f32 %v613_v23 }
 0x2ff   :  { %1104 = vtanh.f32 %v608_v25 }
 0x308   :  { %v1099_v26 = vpop.eup %1098 }
 0x309   :  { %1044 = vmatprep.subr.mxu1 %v1099_v26 }
 0x30a   :  { %v1101_v27 = vpop.eup %1100  ;;  %1045 = vmatpush3.msra.mxu1 %v1099_v26 }
 0x30b   :  { %1046 = vmatprep.subr.mxu1 %v1101_v27  ;;  %v1103_v28 = vpop.eup %1102 }
 0x30c   :  { %1047 = vmatpush3.msra.mxu1 %v1101_v27  ;;  %v1105_v29 = vpop.eup %1104 }
 0x30d   :  { %1048 = vmatprep.subr.mxu1 %v1103_v28 }
 0x30e   :  { %1049 = vmatpush3.msra.mxu1 %v1103_v28 }
 0x30f   :  { %1050 = vmatprep.subr.mxu1 %v1105_v29 }
 0x310   :  { %1051 = vmatpush3.msra.mxu1 %v1105_v29 }
 0x311   :  { %1053 = vmatmul.mubr.msk.f32.vlgmr.msra.gmra.mxu1 %vm439_vm4, %v1271_v63  ;;  %1072 = vmatprep.subr.mxu1 %v1125_v42 }
 0x312   :  { %1055 = vmatprep.mubr.msk.f32.mxu1 %vm439_vm4, %v1276_v0 }
 0x315   :  { %1056 = vmatmul.mubr.msk.f32.gmra.mxu1 %vm439_vm4, %v1285_v1 }
 0x316   :  { %1080 = vmatprep.mubr.msk.f32.mxu1 %vm1126_vm5, %v1125_v42 }
 0x3d1   :  { %v1054_v30 = vpop.f32.mrf.mxu1 }
 0x3d2   :  { %v702_v35 = vadd.f32 %v1054_v30, %v1296_v8 }
 0x3d3   :  { %v696_v31 = vpop.f32.mrf.mxu1 }
 0x3d4   :  { %v697_v37 = vadd.f32 %v696_v31, %v1300_v12 }
 0x3d5   :  { %v1057_v32 = vpop.f32.mrf.mxu1 }
 0x3d6   :  { %v712_v33 = vadd.f32 %v1057_v32, %v1291_v2 }
 0x3d7   :  { %v706_v34 = vpop.f32.mrf.mxu1 }
 0x3d8   :  { %1106 = vtanh.f32 %v712_v33  ;;  %v707_v36 = vadd.f32 %v706_v34, %v1293_v4 }
 0x3da   :  { %1108 = vtanh.f32 %v707_v36 }
 0x3db   :  { %1110 = vtanh.f32 %v702_v35 }
 0x3dc   :  { %1112 = vtanh.f32 %v697_v37 }
 0x3e5   :  { %v1107_v38 = vpop.eup %1106 }
 0x3e6   :  { %1058 = vmatprep.subr.mxu0 %v1107_v38 }
 0x3e7   :  { %v1109_v39 = vpop.eup %1108  ;;  %1059 = vmatpush3.msra.mxu0 %v1107_v38 }
 0x3e8   :  { %1060 = vmatprep.subr.mxu0 %v1109_v39  ;;  %v1111_v40 = vpop.eup %1110 }
 0x3e9   :  { %1061 = vmatpush3.msra.mxu0 %v1109_v39  ;;  %v1113_v41 = vpop.eup %1112 }
 0x3ea   :  { %1062 = vmatprep.subr.mxu0 %v1111_v40 }
 0x3eb   :  { %1063 = vmatpush3.msra.mxu0 %v1111_v40 }
 0x3ec   :  { %1064 = vmatprep.subr.mxu0 %v1113_v41 }
 0x3ed   :  { %1065 = vmatpush3.msra.mxu0 %v1113_v41 }
 0x3ee   :  { %1067 = vmatmul.mubr.msk.f32.vlgmr.msra.gmra.mxu0 %vm439_vm4, %v1271_v63 }
 0x3ef   :  { %1069 = vmatprep.mubr.msk.f32.mxu0 %vm439_vm4, %v1276_v0 }
 0x3f2   :  { %1070 = vmatmul.mubr.msk.f32.gmra.mxu0 %vm439_vm4, %v1285_v1 }
 0x4ae   :  { %v1068_v43 = vpop.f32.mrf.mxu0 }
 0x4af   :  { %v791_v48 = vadd.f32 %v1068_v43, %v1296_v8 }
 0x4b0   :  { %v785_v44 = vpop.f32.mrf.mxu0 }
 0x4b1   :  { %v786_v50 = vadd.f32 %v785_v44, %v1300_v12 }
 0x4b2   :  { %v1071_v45 = vpop.f32.mrf.mxu0 }
 0x4b3   :  { %v801_v46 = vadd.f32 %v1071_v45, %v1291_v2 }
 0x4b4   :  { %v795_v47 = vpop.f32.mrf.mxu0 }
 0x4b5   :  { %1114 = vtanh.f32 %v801_v46  ;;  %v796_v49 = vadd.f32 %v795_v47, %v1293_v4 }
 0x4b7   :  { %1116 = vtanh.f32 %v796_v49 }
 0x4b8   :  { %1118 = vtanh.f32 %v791_v48 }
 0x4b9   :  { %1120 = vtanh.f32 %v786_v50 }
 0x4c2   :  { %v1115_v51 = vpop.eup %1114 }
 0x4c3   :  { %1073 = vmatpush3.msra.mxu1 %v1115_v51 }
 0x4c4   :  { %v1117_v52 = vpop.eup %1116  ;;  %1074 = vmatprep.subr.mxu1 %v1125_v42 }
 0x4c5   :  { %1075 = vmatpush3.msra.mxu1 %v1117_v52  ;;  %v1119_v53 = vpop.eup %1118 }
 0x4c6   :  { %1076 = vmatprep.subr.mxu1 %v1125_v42  ;;  %v1121_v55 = vpop.eup %1120 }
 0x4c7   :  { %1077 = vmatpush3.msra.mxu1 %v1119_v53 }
 0x4c8   :  { %1078 = vmatprep.subr.mxu1 %v1125_v42 }
 0x4c9   :  { %1079 = vmatpush3.msra.mxu1 %v1121_v55 }
 0x4ca   :  { %1081 = vmatmul.mubr.msk.f32.vlgmr.msra.gmra.mxu1 %vm439_vm4, %v808_v54 }
 0x58a   :  { %v884_v57 = vpop.f32.mrf.mxu1 }
 0x58b   :  { %v885_v58 = vadd.f32 %v884_v57, %v813_v56 }
 0x58c   :  { %v1082_v59 = vpop.f32.mrf.mxu1 }
 0x58d   :  { %888 = vst [vmem:[%s1350_s8] sm:$0x3] %v885_v58 }

</bundles_post_ra>
